<compile_context>
chip_gen: v6e
topology: v6e:2x2x1
jax: 0.10.0
libtpu: 0.0.40
codegen_flags: <defaults>
</compile_context>

<pallas_src>
import functools

import jax
import jax.numpy as jnp
from jax import lax
from jax.experimental import pallas as pl
from jax.experimental.pallas import tpu as pltpu


def _round_up(x, m):
    return ((x + m - 1) // m) * m


def conv_relu_kernel(p_ref, w_ref, b_ref, o_ref, acc_ref):
    """Computes one (tm, tn) output tile; K is the (last) reduction grid axis."""
    k = pl.program_id(2)

    @pl.when(k == 0)
    def _():
        acc_ref[...] = jnp.zeros_like(acc_ref)

    # bf16 x bf16 -> f32 accumulate on the MXU.
    acc_ref[...] += jnp.dot(p_ref[...], w_ref[...],
                            preferred_element_type=jnp.float32)

    @pl.when(k == pl.num_programs(2) - 1)
    def _():
        # Bias + ReLU only in the finalize step.
        o_ref[...] = jnp.maximum(acc_ref[...] + b_ref[...], 0.0).astype(o_ref.dtype)


def _pick_tiles(M, K, OC):
    # M axis: 16-granular (bf16 sublane packing); tiles capped at 512.
    Mp = _round_up(M, 16)
    if Mp > 512:
        Mp = _round_up(Mp, 512)
        tm = 512
    else:
        tm = Mp
    # K (contraction) axis: full-extent block when small (no zero padding,
    # allowed because block == array extent); otherwise 512-wide tiles
    # (multiple of 256 -> full MXU passes on v6e/v7x, 128-compatible on v5e).
    if K > 512:
        tk = 512
        Kp = _round_up(K, tk)
    else:
        tk = Kp = K
    # OC axis: lane-dense 128-padded; 256 tiles when divisible (v6e/v7x MXU).
    OCp = _round_up(OC, 128)
    tn = 256 if OCp % 256 == 0 else 128
    return Mp, tm, Kp, tk, OCp, tn


@functools.partial(jax.jit, static_argnames=("stride", "dilation"))
def down_dilated_conv(x, weight, bias, *, stride=4, dilation=2):
    """x: (N, C, H, W) f32; weight: (OC, C, KH, KW); bias: (OC,). Returns NCHW."""
    N, C, H, W = x.shape
    OC, Cw, KH, KW = weight.shape
    assert Cw == C

    eff_kh = dilation * (KH - 1) + 1
    eff_kw = dilation * (KW - 1) + 1
    OH = (H - eff_kh) // stride + 1
    OW = (W - eff_kw) // stride + 1

    # ---- channel-last im2col gather (glue, plain JAX) ----
    x_nhwc = jnp.transpose(x, (0, 2, 3, 1))                                   # (N,H,W,C)
    r = (jnp.arange(OH) * stride)[:, None] + (jnp.arange(KH) * dilation)[None, :]  # (OH,KH)
    c = (jnp.arange(OW) * stride)[:, None] + (jnp.arange(KW) * dilation)[None, :]  # (OW,KW)
    xg = x_nhwc[:, r]                  # (N, OH, KH, W, C)
    xg = xg[:, :, :, c]                # (N, OH, KH, OW, KW, C)
    patches = jnp.transpose(xg, (0, 1, 3, 2, 4, 5)).reshape(N * OH * OW, KH * KW * C)
    # weight (OC,C,KH,KW) -> (KH,KW,C,OC) -> (K, OC); K ordering matches patches.
    w2d = jnp.transpose(weight, (2, 3, 1, 0)).reshape(KH * KW * C, OC)

    M, K = patches.shape
    Mp, tm, Kp, tk, OCp, tn = _pick_tiles(M, K, OC)

    # Pad with jnp.pad (fuses; no zeros+scatter), cast matmul operands to bf16.
    patches_p = jnp.pad(patches, ((0, Mp - M), (0, Kp - K))).astype(jnp.bfloat16)
    w_p = jnp.pad(w2d, ((0, Kp - K), (0, OCp - OC))).astype(jnp.bfloat16)
    b_p = jnp.pad(bias, (0, OCp - OC)).reshape(1, OCp).astype(jnp.float32)

    grid = (Mp // tm, OCp // tn, Kp // tk)
    flops = 2 * Mp * Kp * OCp
    bytes_accessed = (Mp * Kp + Kp * OCp) * 2 + Mp * OCp * 4 + OCp * 4

    out_p = pl.pallas_call(
        conv_relu_kernel,
        out_shape=jax.ShapeDtypeStruct((Mp, OCp), jnp.float32),
        grid_spec=pltpu.PrefetchScalarGridSpec(
            num_scalar_prefetch=0,
            grid=grid,
            in_specs=[
                pl.BlockSpec((tm, tk), lambda i, j, k: (i, k)),   # patches tile
                pl.BlockSpec((tk, tn), lambda i, j, k: (k, j)),   # weight tile
                pl.BlockSpec((1, tn), lambda i, j, k: (0, j)),    # bias (resident)
            ],
            out_specs=pl.BlockSpec((tm, tn), lambda i, j, k: (i, j)),
            scratch_shapes=[pltpu.VMEM((tm, tn), jnp.float32)],   # f32 accumulator
        ),
        compiler_params=pltpu.CompilerParams(
            dimension_semantics=("parallel", "parallel", "arbitrary"),
            vmem_limit_bytes=32 * 1024 * 1024,
        ),
        cost_estimate=pl.CostEstimate(
            flops=flops, transcendentals=0, bytes_accessed=bytes_accessed),
    )(patches_p, w_p, b_p)

    out = out_p[:M, :OC].reshape(N, OH, OW, OC)
    # Module contract is NCHW; keep the final transpose (defer/drop only if the
    # consumer accepts NHWC).
    return jnp.transpose(out, (0, 3, 1, 2))


if __name__ == "__main__":
    # Small shapes consistent with the module: batch=2, in_channel=4,
    # out_channel=8, spatial=16x16 -> output spatial 3x3.
    N, C, OC, H, W = 2, 4, 8, 16, 16
    KH = KW = 4

    key = jax.random.PRNGKey(0)
    kx, kw, kb = jax.random.split(key, 3)
    x = jax.random.normal(kx, (N, C, H, W), dtype=jnp.float32)

    # Deterministic parameter init (PyTorch Conv2d-style uniform bound).
    fan_in = C * KH * KW
    bound = 1.0 / (fan_in ** 0.5)
    weight = jax.random.uniform(kw, (OC, C, KH, KW), jnp.float32, -bound, bound)
    bias = jax.random.uniform(kb, (OC,), jnp.float32, -bound, bound)

    y = down_dilated_conv(x, weight, bias)
    y = jax.block_until_ready(y)

    # Reference: XLA dilated conv on bf16-rounded operands (the kernel's matmul
    # inputs are bf16 with f32 accumulation), same semantics as PyTorch.
    x_r = x.astype(jnp.bfloat16).astype(jnp.float32)
    w_r = weight.astype(jnp.bfloat16).astype(jnp.float32)
    y_ref = lax.conv_general_dilated(
        x_r, w_r, window_strides=(4, 4), padding="VALID",
        rhs_dilation=(2, 2), dimension_numbers=("NCHW", "OIHW", "NCHW"))
    y_ref = jnp.maximum(y_ref + bias[None, :, None, None], 0.0)

    assert y.shape == (N, OC, 3, 3), y.shape
    assert jnp.allclose(y, y_ref, atol=1e-3, rtol=1e-3), float(jnp.max(jnp.abs(y - y_ref)))
    print("KERNEL_OK")
</pallas_src>

<mosaic_0001>
module attributes {stable_mosaic.version = 11 : i64} {
  func.func @conv_relu_kernel(%arg0: i32, %arg1: i32, %arg2: i32, %arg3: memref<32x64xbf16, #tpu.memory_space<vmem>>, %arg4: memref<64x128xbf16, #tpu.memory_space<vmem>>, %arg5: memref<1x128xf32, #tpu.memory_space<vmem>>, %arg6: memref<32x128xf32, #tpu.memory_space<vmem>>, %arg7: memref<32x128xf32, #tpu.memory_space<vmem>>) attributes {dimension_semantics = [#tpu.dimension_semantics<parallel>, #tpu.dimension_semantics<parallel>, #tpu.dimension_semantics<arbitrary>], iteration_bounds = array<i64: 1, 1, 1>, scalar_prefetch = 0 : i64, scratch_operands = 1 : i64, tpu.core_type = #tpu.core_type<tc>, window_params = [{transform_indices = @transform_0, window_bounds = array<i64: 32, 64>}, {transform_indices = @transform_1, window_bounds = array<i64: 64, 128>}, {transform_indices = @transform_2, window_bounds = array<i64: 1, 128>}, {transform_indices = @transform_3, window_bounds = array<i64: 32, 128>}]} {
    %c0_i32 = arith.constant 0 : i32
    %0 = arith.cmpi eq, %arg2, %c0_i32 : i32
    %1 = arith.extui %0 : i1 to i32
    %c0_i32_0 = arith.constant 0 : i32
    %2 = arith.cmpi ne, %1, %c0_i32_0 : i32
    scf.if %2 {
      %cst_10 = arith.constant 0.000000e+00 : f32
      %12 = vector.broadcast %cst_10 : f32 to vector<32x128xf32>
      %c0_11 = arith.constant 0 : index
      %c0_12 = arith.constant 0 : index
      %13 = vector.load %arg7[%c0_11, %c0_12] : memref<32x128xf32, #tpu.memory_space<vmem>>, vector<32x128xf32>
      tpu.vector_store %arg7[%c0_11, %c0_12], %12 {strides = array<i32>} : memref<32x128xf32, #tpu.memory_space<vmem>>, vector<32x128xf32>,
    } else {
    }
    %c0 = arith.constant 0 : index
    %c0_1 = arith.constant 0 : index
    %3 = vector.load %arg7[%c0, %c0_1] : memref<32x128xf32, #tpu.memory_space<vmem>>, vector<32x128xf32>
    %c0_2 = arith.constant 0 : index
    %c0_3 = arith.constant 0 : index
    %4 = vector.load %arg3[%c0_2, %c0_3] : memref<32x64xbf16, #tpu.memory_space<vmem>>, vector<32x64xbf16>
    %c0_4 = arith.constant 0 : index
    %c0_5 = arith.constant 0 : index
    %5 = vector.load %arg4[%c0_4, %c0_5] : memref<64x128xbf16, #tpu.memory_space<vmem>>, vector<64x128xbf16>
    %cst = arith.constant dense<0.000000e+00> : vector<32x128xf32>
    %6 = tpu.matmul %4, %5, %cst {dimension_numbers = #tpu.dot_dimension_numbers<[1], [0], [0], [1], [0, 0, 1, 1], [], []>} : vector<32x64xbf16>, vector<64x128xbf16>, vector<32x128xf32> -> vector<32x128xf32>
    %7 = arith.addf %3, %6 : vector<32x128xf32>
    %c0_6 = arith.constant 0 : index
    %c0_7 = arith.constant 0 : index
    %8 = vector.load %arg7[%c0_6, %c0_7] : memref<32x128xf32, #tpu.memory_space<vmem>>, vector<32x128xf32>
    tpu.vector_store %arg7[%c0_6, %c0_7], %7 {strides = array<i32>} : memref<32x128xf32, #tpu.memory_space<vmem>>, vector<32x128xf32>,
    %c0_i32_8 = arith.constant 0 : i32
    %9 = arith.cmpi eq, %arg2, %c0_i32_8 : i32
    %10 = arith.extui %9 : i1 to i32
    %c0_i32_9 = arith.constant 0 : i32
    %11 = arith.cmpi ne, %10, %c0_i32_9 : i32
    scf.if %11 {
      %c0_10 = arith.constant 0 : index
      %c0_11 = arith.constant 0 : index
      %12 = vector.load %arg7[%c0_10, %c0_11] : memref<32x128xf32, #tpu.memory_space<vmem>>, vector<32x128xf32>
      %c0_12 = arith.constant 0 : index
      %c0_13 = arith.constant 0 : index
      %13 = vector.load %arg5[%c0_12, %c0_13] : memref<1x128xf32, #tpu.memory_space<vmem>>, vector<1x128xf32>
      %14 = vector.broadcast %13 : vector<1x128xf32> to vector<32x128xf32>
      %15 = arith.addf %12, %14 : vector<32x128xf32>
      %cst_14 = arith.constant 0.000000e+00 : f32
      %16 = vector.broadcast %cst_14 : f32 to vector<32x128xf32>
      %17 = arith.maximumf %15, %16 : vector<32x128xf32>
      %c0_15 = arith.constant 0 : index
      %c0_16 = arith.constant 0 : index
      %18 = vector.load %arg6[%c0_15, %c0_16] : memref<32x128xf32, #tpu.memory_space<vmem>>, vector<32x128xf32>
      tpu.vector_store %arg6[%c0_15, %c0_16], %17 {strides = array<i32>} : memref<32x128xf32, #tpu.memory_space<vmem>>, vector<32x128xf32>,
    } else {
    }
    return
  }
  func.func @transform_0(%arg0: i32, %arg1: i32, %arg2: i32) -> (i32, i32) {
    %c0_i32 = arith.constant 0 : i32
    return %arg0, %arg2 : i32, i32
  }
  func.func @transform_1(%arg0: i32, %arg1: i32, %arg2: i32) -> (i32, i32) {
    %c0_i32 = arith.constant 0 : i32
    return %arg2, %arg1 : i32, i32
  }
  func.func @transform_2(%arg0: i32, %arg1: i32, %arg2: i32) -> (i32, i32) {
    %c0_i32 = arith.constant 0 : i32
    %c0_i32_0 = arith.constant 0 : i32
    return %c0_i32, %arg1 : i32, i32
  }
  func.func @transform_3(%arg0: i32, %arg1: i32, %arg2: i32) -> (i32, i32) {
    %c0_i32 = arith.constant 0 : i32
    return %arg0, %arg1 : i32, i32
  }
}

</mosaic_0001>

<bundles_post_ra>
// kernel: down_dilated_conv.1
= control target key start
LH: loop header
LB: loop body
LE: loop exit
PB: predicated region body
PF: predicated region fallthrough
CT: control target
= control target key end

     0   :  { %vm73_vm0 = vcmask 523264   ;;  %s253_s1 = inlined_call_operand.vmem [shape: bf16[64,128], index: 1, kind: input, shape index: {}]   ;;  %s254_s0 = inlined_call_operand.vmem [shape: bf16[32,64], index: 0, kind: input, shape index: {}]   ;;  %s255_s2 = inlined_call_operand.vmem [shape: f32[1,128], index: 2, kind: input, shape index: {}]   ;;  %s256_s3 = inlined_call_operand.vmem [shape: f32[32,128], index: 3, kind: output, shape index: {}]  }
   0x1   :  { %v194_v0 = vld [vmem:[%s253_s1 + $0x18] sm:$0xff]   ;;  %v195_v1 = vld [vmem:[%s253_s1 + $0x10] sm:$0xff]   ;;  %v196_v2 = vld [vmem:[%s253_s1 + $0x8] sm:$0xff]  }
   0x2   :  { %182 = vmatprep.subr.bf16.mxu0 %v194_v0  ;;  %v198_v3 = vld [vmem:[%s254_s0] sm:$0xff]   ;;  %v199_v5 = vld [vmem:[%s254_s0 + $0x8] sm:$0xff]  }
   0x3   :  { %183 = vmatpush3.bf16.msra.mxu0 %v194_v0  ;;  %190 = vmatprep.mubr.msk.bf16.mxu0 %vm73_vm0, %v198_v3  ;;  %v197_v4 = vld [vmem:[%s253_s1] sm:$0xff]  }
   0x4   :  { %184 = vmatprep.subr.bf16.mxu0 %v195_v1  ;;  %v175_v6 = vld [vmem:[%s255_s2] ss:$0 sm:$0xff] }
   0x7   :  { %185 = vmatpush3.bf16.msra.mxu0 %v195_v1 }
   0x8   :  { %186 = vmatprep.subr.bf16.mxu0 %v196_v2 }
   0xb   :  { %187 = vmatpush3.bf16.msra.mxu0 %v196_v2 }
   0xc   :  { %188 = vmatprep.subr.bf16.mxu0 %v197_v4 }
   0xf   :  { %189 = vmatpush3.bf16.msra.mxu0 %v197_v4 }
  0x12   :  { %191 = vmatmul.mubr.msk.bf16.vlgmr.msra.gmra.mxu0 %vm73_vm0, %v199_v5 }
  0xd2   :  { %v192_v7 = vpop.f32.mrf.mxu0 }
  0xd3   :  { %v153_v8 = vadd.f32 %v192_v7, %v175_v6 }
  0xd4   :  { %v114_v9 = vpop.f32.mrf.mxu0 }
  0xd5   :  { %v157_v10 = vmax.f32 %v153_v8, 0.0  ;;  %v151_v11 = vadd.f32 %v175_v6, %v114_v9 }
  0xd6   :  { %v193_v12 = vpop.f32.mrf.mxu0 }
  0xd7   :  { %161 = vst [vmem:[%s256_s3 + $0x10] sm:$0xff] %v157_v10  ;;  %v155_v13 = vmax.f32 %v151_v11, 0.0  ;;  %v154_v14 = vadd.f32 %v193_v12, %v175_v6 }
  0xd8   :  { %v117_v15 = vpop.f32.mrf.mxu0 }
  0xd9   :  { %159 = vst [vmem:[%s256_s3] sm:$0xff] %v155_v13  ;;  %v158_v16 = vmax.f32 %v154_v14, 0.0  ;;  %v152_v17 = vadd.f32 %v175_v6, %v117_v15 }
  0xdb   :  { %162 = vst [vmem:[%s256_s3 + $0x18] sm:$0xff] %v158_v16  ;;  %v156_v18 = vmax.f32 %v152_v17, 0.0 }
  0xdd   :  { %160 = vst [vmem:[%s256_s3 + $0x8] sm:$0xff] %v156_v18 }

</bundles_post_ra>
